<compile_context>
chip_gen: v6e
topology: v6e:2x2x1
jax: 0.10.0
libtpu: 0.0.40
codegen_flags: <defaults>
</compile_context>

<pallas_src>
import math

import jax
import jax.numpy as jnp
from jax.experimental import pallas as pl

# ---- problem sizes (small, consistent with the module) ----------------------
B = 2            # batch
S = 8            # sequence length
H = 32           # hidden_size
V = 128          # vocab size (rows of the tied embedding matrix) -- lane-dense
NUM_CLASSES = 2  # seq_relationship output classes
SR_PAD = 128     # lane-padded width for the seq_relationship head
N_TOT = V + SR_PAD
ROWS = B * S     # flattened sequence rows
LN_EPS = 1e-12

_INV_SQRT2 = 1.0 / math.sqrt(2.0)


def _erf_approx(z):
    """erf via Abramowitz & Stegun 7.1.26 (max abs error ~1.5e-7), f32, VPU+EUP only."""
    p = 0.3275911
    a1, a2, a3, a4, a5 = 0.254829592, -0.284496736, 1.421413741, -1.453152027, 1.061405429
    az = jnp.abs(z)
    t = 1.0 / (1.0 + p * az)
    poly = ((((a5 * t + a4) * t + a3) * t + a2) * t + a1) * t
    y = 1.0 - poly * jnp.exp(-az * az)
    return jnp.where(z < 0.0, -y, y)


def heads_kernel(seq_ref, pooled_ref, wt_ref, bt_ref, rhs_ref, bias_ref,
                 pred_ref, seqrel_ref):
    # ---- BertPredictionHeadTransform: dense -> exact gelu -> LayerNorm (no affine;
    #      gamma/beta are folded into rhs_ref/bias_ref) ----
    x = seq_ref[...]                                                    # (B*S, H) f32
    h = jnp.dot(x, wt_ref[...], preferred_element_type=jnp.float32) + bt_ref[...]
    h = h * 0.5 * (1.0 + _erf_approx(h * _INV_SQRT2))                   # exact-erf gelu
    u = jnp.mean(h, axis=-1, keepdims=True)
    d = h - u
    var = jnp.mean(d * d, axis=-1, keepdims=True)
    h = d * jax.lax.rsqrt(var + LN_EPS)                                 # rsqrt -> EUP slot

    # ---- fused decoder + seq_relationship: one MXU issue --------------------
    # LHS rows: [ h (B*S, H) ; pooled (B, H) ]  (B*S is a sublane-tile multiple of 8)
    lhs = jnp.concatenate([h, pooled_ref[...]], axis=0)                 # (B*S+B, H)
    # RHS cols: [ w_dec_eff (H, V) | w_sr_pad (H, SR_PAD) ], bias hstacked likewise.
    out = jnp.dot(lhs, rhs_ref[...], preferred_element_type=jnp.float32) + bias_ref[...]

    pred_ref[...] = out[0:ROWS, 0:V].astype(pred_ref.dtype)
    seqrel_ref[...] = out[ROWS:ROWS + B, V:N_TOT].astype(seqrel_ref.dtype)


def preprocess_params(params):
    """One-time prep (hoisted out of the per-call forward path).

    Folds the LayerNorm affine into the tied decoder, lane-pads the 2-wide
    seq_relationship head, and packs both projections into one RHS / one bias.
    """
    (w_t, b_t, gamma, beta, emb_w, dec_bias, w_sr, b_sr) = params
    w_dec = emb_w.T                                              # (H, V) tied decoder
    w_dec_eff = gamma.reshape(H, 1) * w_dec                      # diag(gamma) @ w_dec
    dec_bias_eff = dec_bias + jnp.dot(beta, w_dec)               # (1, V)

    w_sr_p = jnp.zeros((H, SR_PAD), jnp.float32).at[:, :NUM_CLASSES].set(w_sr)
    b_sr_p = jnp.zeros((1, SR_PAD), jnp.float32).at[:, :NUM_CLASSES].set(b_sr)

    rhs = jnp.concatenate([w_dec_eff, w_sr_p], axis=1)           # (H, V + SR_PAD)
    bias = jnp.concatenate([dec_bias_eff, b_sr_p], axis=1)       # (1, V + SR_PAD)
    return (w_t, b_t, rhs, bias)


def bert_pretraining_heads(sequence_output, pooled_output, prepped):
    """sequence_output: (B,S,H) f32; pooled_output: (B,H) f32; prepped from preprocess_params.

    Returns (prediction_scores (B,S,V), seq_relationship_score (B,2)).
    """
    w_t, b_t, rhs, bias = prepped
    seq2d = sequence_output.reshape(ROWS, H)                     # one wide matmul chain

    pred2d, seqrel_p = pl.pallas_call(
        heads_kernel,
        out_shape=(jax.ShapeDtypeStruct((ROWS, V), jnp.float32),
                   jax.ShapeDtypeStruct((B, SR_PAD), jnp.float32)),
    )(seq2d, pooled_output, w_t, b_t, rhs, bias)

    return pred2d.reshape(B, S, V), seqrel_p[:, :NUM_CLASSES]


def reference(sequence_output, pooled_output, params):
    """Plain-JAX reference replicating the PyTorch forward (exact lax.erf gelu)."""
    (w_t, b_t, gamma, beta, emb_w, dec_bias, w_sr, b_sr) = params
    hp = jax.lax.Precision.HIGHEST
    h = jnp.dot(sequence_output, w_t, precision=hp) + b_t
    h = h * 0.5 * (1.0 + jax.lax.erf(h * _INV_SQRT2))
    u = h.mean(-1, keepdims=True)
    s = ((h - u) ** 2).mean(-1, keepdims=True)
    h = (h - u) / jnp.sqrt(s + LN_EPS)
    h = gamma * h + beta
    pred = jnp.dot(h, emb_w.T, precision=hp) + dec_bias
    seqrel = jnp.dot(pooled_output, w_sr, precision=hp) + b_sr
    return pred, seqrel


def make_params(key):
    ks = jax.random.split(key, 7)
    w_t = jax.random.normal(ks[0], (H, H), jnp.float32) * 0.02      # transform.dense (in,out)
    b_t = jax.random.normal(ks[1], (1, H), jnp.float32) * 0.02
    gamma = 1.0 + jax.random.normal(ks[2], (1, H), jnp.float32) * 0.1  # LN weight
    beta = jax.random.normal(ks[3], (1, H), jnp.float32) * 0.1         # LN bias
    emb_w = jax.random.normal(ks[4], (V, H), jnp.float32) * 0.02    # tied embedding matrix (V,H)
    dec_bias = jax.random.normal(ks[5], (1, V), jnp.float32) * 0.02  # BertLMPredictionHead.bias
    w_sr = jax.random.normal(ks[6], (H, NUM_CLASSES), jnp.float32) * 0.02
    b_sr = jnp.zeros((1, NUM_CLASSES), jnp.float32).at[0, 0].set(0.01).at[0, 1].set(-0.01)
    return (w_t, b_t, gamma, beta, emb_w, dec_bias, w_sr, b_sr)


if __name__ == "__main__":
    key = jax.random.PRNGKey(0)
    k_seq, k_pool, k_par = jax.random.split(key, 3)

    sequence_output = jax.random.normal(k_seq, (B, S, H), jnp.float32)
    pooled_output = jax.random.normal(k_pool, (B, H), jnp.float32)
    params = make_params(k_par)

    # One-time parameter preprocessing (not part of the per-call forward path).
    prepped = jax.block_until_ready(preprocess_params(params))

    fwd = jax.jit(bert_pretraining_heads)
    pred, seqrel = fwd(sequence_output, pooled_output, prepped)
    pred, seqrel = jax.block_until_ready((pred, seqrel))

    ref_pred, ref_seqrel = reference(sequence_output, pooled_output, params)

    assert pred.shape == (B, S, V)
    assert seqrel.shape == (B, NUM_CLASSES)
    assert jnp.allclose(pred, ref_pred, atol=2e-4, rtol=2e-4), "prediction_scores mismatch"
    assert jnp.allclose(seqrel, ref_seqrel, atol=2e-4, rtol=2e-4), "seq_relationship mismatch"

    print("KERNEL_OK")
</pallas_src>

<mosaic_0001>
module attributes {stable_mosaic.version = 11 : i64} {
  func.func @heads_kernel(%arg0: memref<16x32xf32, #tpu.memory_space<vmem>>, %arg1: memref<2x32xf32, #tpu.memory_space<vmem>>, %arg2: memref<32x32xf32, #tpu.memory_space<vmem>>, %arg3: memref<1x32xf32, #tpu.memory_space<vmem>>, %arg4: memref<32x256xf32, #tpu.memory_space<vmem>>, %arg5: memref<1x256xf32, #tpu.memory_space<vmem>>, %arg6: memref<16x128xf32, #tpu.memory_space<vmem>>, %arg7: memref<2x128xf32, #tpu.memory_space<vmem>>) attributes {dimension_semantics = [], scalar_prefetch = 0 : i64, scratch_operands = 0 : i64, tpu.core_type = #tpu.core_type<tc>} {
    %c0 = arith.constant 0 : index
    %c0_0 = arith.constant 0 : index
    %0 = vector.load %arg0[%c0, %c0_0] : memref<16x32xf32, #tpu.memory_space<vmem>>, vector<16x32xf32>
    %c0_1 = arith.constant 0 : index
    %c0_2 = arith.constant 0 : index
    %1 = vector.load %arg2[%c0_1, %c0_2] : memref<32x32xf32, #tpu.memory_space<vmem>>, vector<32x32xf32>
    %cst = arith.constant dense<0.000000e+00> : vector<16x32xf32>
    %2 = tpu.matmul %0, %1, %cst {dimension_numbers = #tpu.dot_dimension_numbers<[1], [0], [0], [1], [0, 0, 1, 1], [], []>} : vector<16x32xf32>, vector<32x32xf32>, vector<16x32xf32> -> vector<16x32xf32>
    %c0_3 = arith.constant 0 : index
    %c0_4 = arith.constant 0 : index
    %3 = vector.load %arg3[%c0_3, %c0_4] : memref<1x32xf32, #tpu.memory_space<vmem>>, vector<1x32xf32>
    %4 = vector.broadcast %3 : vector<1x32xf32> to vector<16x32xf32>
    %5 = arith.addf %2, %4 : vector<16x32xf32>
    %cst_5 = arith.constant 5.000000e-01 : f32
    %6 = vector.broadcast %cst_5 : f32 to vector<16x32xf32>
    %7 = arith.mulf %5, %6 : vector<16x32xf32>
    %cst_6 = arith.constant 0.707106769 : f32
    %8 = vector.broadcast %cst_6 : f32 to vector<16x32xf32>
    %9 = arith.mulf %5, %8 : vector<16x32xf32>
    %10 = math.absf %9 : vector<16x32xf32>
    %cst_7 = arith.constant 0.327591091 : f32
    %11 = vector.broadcast %cst_7 : f32 to vector<16x32xf32>
    %12 = arith.mulf %11, %10 : vector<16x32xf32>
    %cst_8 = arith.constant 1.000000e+00 : f32
    %13 = vector.broadcast %cst_8 : f32 to vector<16x32xf32>
    %14 = arith.addf %13, %12 : vector<16x32xf32>
    %cst_9 = arith.constant 1.000000e+00 : f32
    %15 = vector.broadcast %cst_9 : f32 to vector<16x32xf32>
    %16 = arith.divf %15, %14 : vector<16x32xf32>
    %cst_10 = arith.constant 1.06140542 : f32
    %17 = vector.broadcast %cst_10 : f32 to vector<16x32xf32>
    %18 = arith.mulf %17, %16 : vector<16x32xf32>
    %cst_11 = arith.constant -1.45315206 : f32
    %19 = vector.broadcast %cst_11 : f32 to vector<16x32xf32>
    %20 = arith.addf %18, %19 : vector<16x32xf32>
    %21 = arith.mulf %20, %16 : vector<16x32xf32>
    %cst_12 = arith.constant 1.42141378 : f32
    %22 = vector.broadcast %cst_12 : f32 to vector<16x32xf32>
    %23 = arith.addf %21, %22 : vector<16x32xf32>
    %24 = arith.mulf %23, %16 : vector<16x32xf32>
    %cst_13 = arith.constant -0.284496725 : f32
    %25 = vector.broadcast %cst_13 : f32 to vector<16x32xf32>
    %26 = arith.addf %24, %25 : vector<16x32xf32>
    %27 = arith.mulf %26, %16 : vector<16x32xf32>
    %cst_14 = arith.constant 0.254829586 : f32
    %28 = vector.broadcast %cst_14 : f32 to vector<16x32xf32>
    %29 = arith.addf %27, %28 : vector<16x32xf32>
    %30 = arith.mulf %29, %16 : vector<16x32xf32>
    %cst_15 = arith.constant 0.000000e+00 : f32
    %31 = vector.broadcast %cst_15 : f32 to vector<16x32xf32>
    %32 = arith.subf %31, %10 : vector<16x32xf32>
    %33 = arith.mulf %32, %10 : vector<16x32xf32>
    %34 = math.exp %33 : vector<16x32xf32>
    %35 = arith.mulf %30, %34 : vector<16x32xf32>
    %cst_16 = arith.constant 1.000000e+00 : f32
    %36 = vector.broadcast %cst_16 : f32 to vector<16x32xf32>
    %37 = arith.subf %36, %35 : vector<16x32xf32>
    %cst_17 = arith.constant 0.000000e+00 : f32
    %38 = vector.broadcast %cst_17 : f32 to vector<16x32xf32>
    %39 = arith.cmpf olt, %9, %38 : vector<16x32xf32>
    %cst_18 = arith.constant 0.000000e+00 : f32
    %40 = vector.broadcast %cst_18 : f32 to vector<16x32xf32>
    %41 = arith.subf %40, %37 : vector<16x32xf32>
    %42 = arith.select %39, %41, %37 : vector<16x32xi1>, vector<16x32xf32>
    %cst_19 = arith.constant 1.000000e+00 : f32
    %43 = vector.broadcast %cst_19 : f32 to vector<16x32xf32>
    %44 = arith.addf %43, %42 : vector<16x32xf32>
    %45 = arith.mulf %7, %44 : vector<16x32xf32>
    %cst_20 = arith.constant dense<0.000000e+00> : vector<16xf32>
    %46 = vector.multi_reduction <add>, %45, %cst_20 [1] : vector<16x32xf32> to vector<16xf32>
    %47 = vector.shape_cast %46 : vector<16xf32> to vector<16x1xf32>
    %cst_21 = arith.constant 3.200000e+01 : f32
    %48 = vector.broadcast %cst_21 : f32 to vector<16x1xf32>
    %49 = arith.divf %47, %48 : vector<16x1xf32>
    %50 = vector.broadcast %49 : vector<16x1xf32> to vector<16x32xf32>
    %51 = arith.subf %45, %50 : vector<16x32xf32>
    %52 = arith.mulf %51, %51 : vector<16x32xf32>
    %cst_22 = arith.constant dense<0.000000e+00> : vector<16xf32>
    %53 = vector.multi_reduction <add>, %52, %cst_22 [1] : vector<16x32xf32> to vector<16xf32>
    %54 = vector.shape_cast %53 : vector<16xf32> to vector<16x1xf32>
    %cst_23 = arith.constant 3.200000e+01 : f32
    %55 = vector.broadcast %cst_23 : f32 to vector<16x1xf32>
    %56 = arith.divf %54, %55 : vector<16x1xf32>
    %cst_24 = arith.constant 9.99999996E-13 : f32
    %57 = vector.broadcast %cst_24 : f32 to vector<16x1xf32>
    %58 = arith.addf %56, %57 : vector<16x1xf32>
    %59 = math.rsqrt %58 : vector<16x1xf32>
    %60 = vector.broadcast %59 : vector<16x1xf32> to vector<16x32xf32>
    %61 = arith.mulf %51, %60 : vector<16x32xf32>
    %c0_25 = arith.constant 0 : index
    %c0_26 = arith.constant 0 : index
    %62 = vector.load %arg1[%c0_25, %c0_26] : memref<2x32xf32, #tpu.memory_space<vmem>>, vector<2x32xf32>
    %63 = tpu.concatenate %61, %62 in 0 : vector<16x32xf32>, vector<2x32xf32> -> vector<18x32xf32>
    %c0_27 = arith.constant 0 : index
    %c0_28 = arith.constant 0 : index
    %64 = vector.load %arg4[%c0_27, %c0_28] : memref<32x256xf32, #tpu.memory_space<vmem>>, vector<32x256xf32>
    %cst_29 = arith.constant dense<0.000000e+00> : vector<18x256xf32>
    %65 = tpu.matmul %63, %64, %cst_29 {dimension_numbers = #tpu.dot_dimension_numbers<[1], [0], [0], [1], [0, 0, 1, 1], [], []>} : vector<18x32xf32>, vector<32x256xf32>, vector<18x256xf32> -> vector<18x256xf32>
    %c0_30 = arith.constant 0 : index
    %c0_31 = arith.constant 0 : index
    %66 = vector.load %arg5[%c0_30, %c0_31] : memref<1x256xf32, #tpu.memory_space<vmem>>, vector<1x256xf32>
    %67 = vector.broadcast %66 : vector<1x256xf32> to vector<18x256xf32>
    %68 = arith.addf %65, %67 : vector<18x256xf32>
    %69 = vector.extract_strided_slice %68 {offsets = [0, 0], sizes = [16, 128], strides = [1, 1]} : vector<18x256xf32> to vector<16x128xf32>
    %c0_32 = arith.constant 0 : index
    %c0_33 = arith.constant 0 : index
    %70 = vector.load %arg6[%c0_32, %c0_33] : memref<16x128xf32, #tpu.memory_space<vmem>>, vector<16x128xf32>
    tpu.vector_store %arg6[%c0_32, %c0_33], %69 {strides = array<i32>} : memref<16x128xf32, #tpu.memory_space<vmem>>, vector<16x128xf32>,
    %71 = vector.extract_strided_slice %68 {offsets = [16, 128], sizes = [2, 128], strides = [1, 1]} : vector<18x256xf32> to vector<2x128xf32>
    %c0_34 = arith.constant 0 : index
    %c0_35 = arith.constant 0 : index
    %72 = vector.load %arg7[%c0_34, %c0_35] : memref<2x128xf32, #tpu.memory_space<vmem>>, vector<2x128xf32>
    tpu.vector_store %arg7[%c0_34, %c0_35], %71 {strides = array<i32>} : memref<2x128xf32, #tpu.memory_space<vmem>>, vector<2x128xf32>,
    return
  }
}

</mosaic_0001>

<bundles_post_ra>
// kernel: bert_pretraining_heads.1
= control target key start
LH: loop header
LB: loop body
LE: loop exit
PB: predicated region body
PF: predicated region fallthrough
CT: control target
= control target key end

     0   :  { %13 = vsyncpa [#allocation3], 0  ;;  %s634_s0 = inlined_call_operand.hbm [shape: f32[16,32], index: 0, kind: input, shape index: {}]   ;;  %s635_s1 = inlined_call_operand.vmem [shape: f32[2,32], index: 1, kind: input, shape index: {}]   ;;  %s636_s2 = inlined_call_operand.hbm [shape: f32[32,32], index: 2, kind: input, shape index: {}]   ;;  %s637_s3 = inlined_call_operand.vmem [shape: f32[1,32], index: 3, kind: input, shape index: {}]   ;;  %s638_s4 = inlined_call_operand.hbm [shape: f32[32,256], index: 4, kind: input, shape index: {}]   ;;  %s639_s5 = inlined_call_operand.vmem [shape: f32[1,256], index: 5, kind: input, shape index: {}]   ;;  %s640_s6 = inlined_call_operand.hbm [shape: f32[16,128], index: 6, kind: output, shape index: {0}]   ;;  %s641_s7 = inlined_call_operand.hbm [shape: f32[2,128], index: 7, kind: output, shape index: {1}]  }
   0x1   :  { %14 = vsyncpa [#allocation6], 0 }
   0x2   :  { %15 = vsyncpa [#allocation4], 0 }
   0x3   :  { %16 = vsyncpa [#allocation10], 0  ;;  %s542_s24 = smov [#allocation5]   ;;  %s543_s26 = smov [#allocation2]  }
   0x4   :  { %s36_s25 = sshll.u32 %s542_s24, 4  ;;  %s22_s27 = sshll.u32 %s543_s26, 4  ;;  %s37_s25 = int_to_ptr.vmem [resolvable:$true] %s36_s25  ;;  %s23_s27 = int_to_ptr.vmem [resolvable:$true] %s22_s27 }
   0x5   :  { %s442_s28 = scalar_lea.vmem %s37_s25, 512  ;;  %p447_p1 = scmp.lt.s32.totalorder %s37_s25, %s37_s25 }
   0x6   :  { %p443_p0 = scmp.ne.s32.totalorder %s37_s25, %s442_s28  ;;  %p448_p2 = scmp.lt.s32.totalorder %s442_s28, %s442_s28 }
   0x8   :  { %p449_p3 = por %p448_p2, %p447_p1 }
   0xa   :  { %p450_p4 = pnand %p449_p3, %p443_p0 }
   0xc   :  { %453 = shalt.err (!%p450_p4)
}
   0xd   :  { %s544_s29 = smov 128   ;;  %s545_s30 = smov 8  }
   0xe   :  { %42 = dma.hbm_to_vmem [thread:$0]  %s636_s2, 512, %s37_s25, [#allocation6], %s544_s29, %s544_s29, %s545_s30  }
   0xf   :  { %s462_s10 = scalar_lea.vmem %s23_s27, 256  ;;  %p467_p6 = scmp.lt.s32.totalorder %s23_s27, %s23_s27 }
  0x10   :  { %p463_p5 = scmp.ne.s32.totalorder %s23_s27, %s462_s10  ;;  %p468_p7 = scmp.lt.s32.totalorder %s462_s10, %s462_s10 }
  0x12   :  { %p469_p8 = por %p468_p7, %p467_p6 }
  0x14   :  { %p470_p9 = pnand %p469_p8, %p463_p5 }
  0x16   :  { %473 = shalt.err (!%p470_p9)
}
  0x17   :  { %28 = dma.hbm_to_vmem [thread:$0]  %s634_s0, 256, %s23_s27, [#allocation3], %s544_s29, %s544_s29, %s545_s30  }
  0x18   :  { %s546_s13 = smov [#allocation7]  }
  0x19   :  { %s50_s14 = sshll.u32 %s546_s13, 4  ;;  %s51_s14 = int_to_ptr.vmem [resolvable:$true] %s50_s14 }
  0x1a   :  { %s482_s15 = scalar_lea.vmem %s51_s14, 1024  ;;  %p487_p11 = scmp.lt.s32.totalorder %s51_s14, %s51_s14 }
  0x1b   :  { %p483_p10 = scmp.ne.s32.totalorder %s51_s14, %s482_s15  ;;  %p488_p12 = scmp.lt.s32.totalorder %s482_s15, %s482_s15 }
  0x1d   :  { %p489_p13 = por %p488_p12, %p487_p11 }
  0x1f   :  { %p490_p0 = pnand %p489_p13, %p483_p10 }
  0x21   :  { %493 = shalt.err (!%p490_p0)
}
  0x22   :  { %s547_s2 = smov 256   ;;  %s548_s16 = smov 16  }
  0x23   :  { %56 = dma.hbm_to_vmem [thread:$0]  %s638_s4, 1024, %s51_s14, [#allocation6], %s547_s2, %s547_s2, %s548_s16  }
  0x24   :  { %534 = dma.done.wait [#allocation3], 256  }
  0x25   :  { %535 = vsyncadd [#allocation3], 4294967040 }
  0x26   :  { %536 = dma.done.wait [#allocation6], 1536  }
  0x27   :  { %537 = vsyncadd [#allocation6], 4294965760  ;;  %vm81_vm0 = vcmask 261120   ;;  %v73_v0 = vld [vmem:[#allocation5 + $0x18] sm:$0xff]  ;;  %v72_v1 = vld [vmem:[#allocation5 + $0x10] sm:$0xff]  ;;  %s550_s22 = smov [#allocation8]  }
  0x28   :  { %401 = vmatprep.subr.mxu0 %v73_v0  ;;  %v68_v2 = vld [vmem:[#allocation2] sm:$0xff]  ;;  %v71_v3 = vld [vmem:[#allocation5 + $0x8] sm:$0xff]  ;;  %v70_v4 = vld [vmem:[#allocation5] sm:$0xff]  ;;  %s362_s23 = sshll.u32 %s550_s22, 4  ;;  %s363_s23 = int_to_ptr.vmem [resolvable:$true] %s362_s23 }
  0x29   :  { %402 = vmatpush3.msra.mxu0 %v73_v0  ;;  %409 = vmatprep.mubr.msk.f32.mxu0 %vm81_vm0, %v68_v2  ;;  %v69_v5 = vld [vmem:[#allocation2 + $0x8] sm:$0xff]  ;;  %v389_v6 = vld [vmem:[%s637_s3] ss:$0 sm:$0xff]  ;;  %s494_s25 = scalar_lea.vmem %s363_s23, 256  ;;  %p499_p2 = scmp.lt.s32.totalorder %s363_s23, %s363_s23 }
  0x2a   :  { %403 = vmatprep.subr.mxu0 %v72_v1  ;;  %p495_p1 = scmp.ne.s32.totalorder %s363_s23, %s494_s25  ;;  %p500_p3 = scmp.lt.s32.totalorder %s494_s25, %s494_s25 }
  0x2b   :  { %404 = vmatpush3.msra.mxu0 %v72_v1 }
  0x2c   :  { %405 = vmatprep.subr.mxu0 %v71_v3  ;;  %p501_p4 = por %p500_p3, %p499_p2 }
  0x2d   :  { %406 = vmatpush3.msra.mxu0 %v71_v3 }
  0x2e   :  { %407 = vmatprep.subr.mxu0 %v70_v4  ;;  %p502_p5 = pnand %p501_p4, %p495_p1 }
  0x2f   :  { %408 = vmatpush3.msra.mxu0 %v70_v4 }
  0x30   :  { %410 = vmatmul.mubr.msk.f32.vlgmr.msra.gmra.mxu0 %vm81_vm0, %v69_v5 }
  0xf0   :  { %v411_v7 = vpop.f32.mrf.mxu0 }
  0xf1   :  { %v160_v8 = vadd.f32 %v411_v7, %v389_v6 }
  0xf2   :  { %v154_v9 = vpop.f32.mrf.mxu0 }
  0xf3   :  { %v166_v10 = vmul.f32 0.70710677, %v160_v8  ;;  %v155_v11 = vadd.f32 %v389_v6, %v154_v9  ;;  %v164_v58 = vmul.f32 0.5, %v160_v8  ;;  %v252_v9 = vld [vmem:[#allocation7 + $0x38] sm:$0xff] }
  0xf4   :  { %298 = vmatprep.subr.mxu1 %v252_v9 }
  0xf5   :  { %v168_v12 = vand.u32 2147483647, %v166_v10  ;;  %v165_v13 = vmul.f32 0.70710677, %v155_v11  ;;  %vm208_vm1 = vcmp.lt.f32.partialorder %v166_v10, 0.0  ;;  %v163_v55 = vmul.f32 0.5, %v155_v11 }
  0xf6   :  { %v251_v10 = vld [vmem:[#allocation7 + $0x30] sm:$0xff]  ;;  %v250_v11 = vld [vmem:[#allocation7 + $0x28] sm:$0xff] }
  0xf7   :  { %v170_v14 = vmul.f32 0.3275911, %v168_v12  ;;  %v167_v15 = vand.u32 2147483647, %v165_v13  ;;  %v196_v19 = vsub.f32 0.0, %v168_v12  ;;  %vm207_vm2 = vcmp.lt.f32.partialorder %v165_v13, 0.0  ;;  %299 = vmatpush1.msra.mxu1 %v251_v10 }
  0xf8   :  { %v549_v13 = vmov 0.0   ;;  %300 = vmatprep.subr.mxu1 %v250_v11 }
  0xf9   :  { %v172_v16 = vadd.f32 1.0, %v170_v14  ;;  %v169_v17 = vmul.f32 0.3275911, %v167_v15  ;;  %v195_v20 = vsub.f32 0.0, %v167_v15  ;;  %v198_v21 = vmul.f32 %v196_v19, %v168_v12  ;;  %v249_v12 = vld [vmem:[#allocation7 + $0x20] sm:$0xff]  ;;  %338 = vmatprep.mubr.f32.mxu1 %v549_v13  ;;  %v248_v14 = vld [vmem:[#allocation7 + $0x18] sm:$0xff] }
  0xfa   :  { %301 = vmatpush1.msra.mxu1 %v249_v12 }
  0xfb   :  { %422 = vrcp.f32 %v172_v16  ;;  %v171_v18 = vadd.f32 1.0, %v169_v17  ;;  %v197_v23 = vmul.f32 %v195_v20, %v167_v15  ;;  %v201_v24 = vmul.f32 1.442695, %v198_v21  ;;  %v247_v15 = vld [vmem:[#allocation7 + $0x10] sm:$0xff]  ;;  %v246_v16 = vld [vmem:[#allocation7 + $0x8] sm:$0xff]  ;;  %302 = vmatprep.subr.mxu1 %v248_v14  ;;  %v245_v17 = vld [vmem:[#allocation7] sm:$0xff] }
  0xfc   :  { %303 = vmatpush1.msra.mxu1 %v247_v15 }
  0xfd   :  { %424 = vrcp.f32 %v171_v18  ;;  %v199_v28 = vmul.f32 1.442695, %v197_v23  ;;  %304 = vmatprep.subr.mxu1 %v246_v16 }
  0xfe   :  { %426 = vpow2.f32 %v201_v24  ;;  %305 = vmatpush1.msra.mxu1 %v245_v17 }
  0xff   :  { %428 = vpow2.f32 %v199_v28  ;;  %v244_v28 = vld [vmem:[%s635_s1] sm:$0x3]  ;;  %s551_s1 = smov [#allocation9]  }
 0x100   :  { %s375_s24 = sshll.u32 %s551_s1, 4  ;;  %s376_s24 = int_to_ptr.vmem [resolvable:$true] %s375_s24 }
 0x108   :  { %v423_v22 = vpop.eup %422 }
 0x109   :  { %v178_v25 = vmul.f32 1.0614054, %v423_v22 }
 0x10a   :  { %v425_v26 = vpop.eup %424 }
 0x10b   :  { %v180_v27 = vadd.f32 -1.4531521, %v178_v25  ;;  %v177_v29 = vmul.f32 1.0614054, %v425_v26  ;;  %v427_v43 = vpop.eup %426 }
 0x10c   :  { %v429_v47 = vpop.eup %428 }
 0x10d   :  { %v182_v30 = vmul.f32 %v423_v22, %v180_v27  ;;  %v179_v31 = vadd.f32 -1.4531521, %v177_v29  ;;  %v255_v29 = vlaneseq }
 0x10f   :  { %v184_v32 = vadd.f32 1.4214138, %v182_v30  ;;  %v181_v33 = vmul.f32 %v425_v26, %v179_v31  ;;  %v256_v30 = vshrl.u32 %v255_v29, 7 }
 0x111   :  { %v186_v34 = vmul.f32 %v423_v22, %v184_v32  ;;  %v183_v35 = vadd.f32 1.4214138, %v181_v33  ;;  %v257_v31 = vsub.s32 0, %v256_v30  ;;  %v253_v32 = vld [vmem:[%s639_s5] sm:$0x3] }
 0x113   :  { %v188_v36 = vadd.f32 -0.28449672, %v186_v34  ;;  %v185_v37 = vmul.f32 %v425_v26, %v183_v35  ;;  %v258_v33 = vrot.slane %v253_v32, %v257_v31 }
 0x115   :  { %v190_v38 = vmul.f32 %v423_v22, %v188_v36  ;;  %v187_v39 = vadd.f32 -0.28449672, %v185_v37  ;;  %v261_v37 = vsub.s32 1, %v256_v30 }
 0x117   :  { %v192_v40 = vadd.f32 0.2548296, %v190_v38  ;;  %v189_v41 = vmul.f32 %v425_v26, %v187_v39 }
 0x119   :  { %v194_v42 = vmul.f32 %v423_v22, %v192_v40  ;;  %v191_v44 = vadd.f32 0.2548296, %v189_v41  ;;  %v262_v41 = vrot.slane %v253_v32, %v261_v37 }
 0x11b   :  { %v204_v45 = vmul.f32 %v427_v43, %v194_v42  ;;  %v193_v46 = vmul.f32 %v425_v26, %v191_v44 }
 0x11d   :  { %v206_v48 = vsub.f32 1.0, %v204_v45  ;;  %v203_v49 = vmul.f32 %v429_v47, %v193_v46 }
 0x11f   :  { %v210_v50 = vsub.f32 0.0, %v206_v48  ;;  %v205_v51 = vsub.f32 1.0, %v203_v49 }
 0x121   :  { %v209_v52 = vsub.f32 0.0, %v205_v51  ;;  %v212_v53 = vsel %vm208_vm1, %v210_v50, %v206_v48 }
 0x122   :  { %v214_v57 = vadd.f32 1.0, %v212_v53 }
 0x123   :  { %v211_v54 = vsel %vm207_vm2, %v209_v52, %v205_v51 }
 0x124   :  { %v213_v56 = vadd.f32 1.0, %v211_v54  ;;  %v216_v61 = vmul.f32 %v214_v57, %v164_v58 }
 0x126   :  { %v215_v59 = vmul.f32 %v213_v56, %v163_v55  ;;  %v220_v62 = vsel %vm81_vm0, %v216_v61, 0.0 }
 0x128   :  { %v217_v60 = vsel %vm81_vm0, %v215_v59, 0.0 }
 0x129   :  { %218 = vadd.xlane.f32.xlu0 %v217_v60 }
 0x12d   :  { %221 = vadd.xlane.f32.xlu0 %v220_v62 }
 0x1b2   :  { %v219_v63 = vpop.xlane.xlu0 %218 }
 0x1b3   :  { %v224_v0 = vmul.f32 0.03125, %v219_v63 }
 0x1b5   :  { %v226_v1 = vsub.f32 %v215_v59, %v224_v0 }
 0x1b6   :  { %v222_v2 = vpop.xlane.xlu0 %221 }
 0x1b7   :  { %v225_v3 = vmul.f32 0.03125, %v222_v2  ;;  %v228_v4 = vmul.f32 %v226_v1, %v226_v1 }
 0x1b9   :  { %v227_v5 = vsub.f32 %v216_v61, %v225_v3  ;;  %v230_v6 = vsel %vm81_vm0, %v228_v4, 0.0 }
 0x1ba   :  { %231 = vadd.xlane.f32.xlu1 %v230_v6 }
 0x1bb   :  { %v229_v7 = vmul.f32 %v227_v5, %v227_v5 }
 0x1bd   :  { %v233_v8 = vsel %vm81_vm0, %v229_v7, 0.0 }
 0x1be   :  { %234 = vadd.xlane.f32.xlu1 %v233_v8 }
 0x243   :  { %v232_v18 = vpop.xlane.xlu1 %231 }
 0x244   :  { %v236_v19 = vmul.f32 0.03125, %v232_v18 }
 0x246   :  { %v238_v20 = vadd.f32 1e-12, %v236_v19 }
 0x247   :  { %v235_v21 = vpop.xlane.xlu1 %234 }
 0x248   :  { %430 = vrsqrt.f32 %v238_v20  ;;  %v237_v22 = vmul.f32 0.03125, %v235_v21 }
 0x24a   :  { %v239_v23 = vadd.f32 1e-12, %v237_v22 }
 0x24c   :  { %432 = vrsqrt.f32 %v239_v23 }
 0x255   :  { %v431_v24 = vpop.eup %430 }
 0x256   :  { %v242_v25 = vmul.f32 %v431_v24, %v226_v1 }
 0x258   :  { %392 = vmatmul.mubr.msk.f32.vlgmr.msra.gmra.mxu1 %vm81_vm0, %v242_v25 }
 0x259   :  { %v433_v26 = vpop.eup %432  ;;  %343 = vmatprep.mubr.f32.mxu1 %v549_v13 }
 0x25a   :  { %v243_v27 = vmul.f32 %v433_v26, %v227_v5 }
 0x25c   :  { %393 = vmatmul.mubr.msk.f32.gmra.mxu1 %vm81_vm0, %v243_v27 }
 0x25d   :  { %348 = vmatprep.mubr.f32.mxu1 %v549_v13 }
 0x260   :  { %394 = vmatmul.mubr.msk.f32.gmra.mxu1 %vm81_vm0, %v244_v28 }
 0x318   :  { %v340_v34 = vpop.f32.mrf.mxu1 }
 0x319   :  { %v341_v35 = vadd.f32 %v340_v34, %v258_v33 }
 0x31a   :  { %v342_v36 = vpop.f32.mrf.mxu1 }
 0x31b   :  { %354 = vst [vmem:[#allocation8] sm:$0xff] %v341_v35 }
 0x31c   :  { %v345_v38 = vpop.f32.mrf.mxu1 }
 0x31d   :  { %v346_v39 = vadd.f32 %v345_v38, %v258_v33 }
 0x31e   :  { %v347_v40 = vpop.f32.mrf.mxu1 }
 0x31f   :  { %355 = vst [vmem:[#allocation8 + $0x8] sm:$0xff] %v346_v39 }
 0x320   :  { %v350_v42 = vpop.f32.mrf.mxu1 }
 0x321   :  { %505 = shalt.err (!%p502_p5)
}
 0x322   :  { %368 = dma.vmem_to_hbm [thread:$0]  %s363_s23, 256, %s640_s6, [#allocation4], %s544_s29, %s544_s29, %s545_s30   ;;  %v351_v43 = vpop.f32.mrf.mxu1 }
 0x323   :  { %v352_v44 = vadd.f32 %v351_v43, %v262_v41  ;;  %s514_s27 = scalar_lea.vmem %s376_s24, 32  ;;  %p519_p7 = scmp.lt.s32.totalorder %s376_s24, %s376_s24 }
 0x324   :  { %p515_p6 = scmp.ne.s32.totalorder %s376_s24, %s514_s27  ;;  %p520_p8 = scmp.lt.s32.totalorder %s514_s27, %s514_s27 }
 0x325   :  { %356 = vst [vmem:[#allocation9] sm:$0x3] %v352_v44 }
 0x326   :  { %p521_p9 = por %p520_p8, %p519_p7 }
 0x328   :  { %p522_p10 = pnand %p521_p9, %p515_p6 }
 0x32a   :  { %525 = shalt.err (!%p522_p10)
}
 0x32b   :  { %378 = dma.vmem_to_hbm [thread:$0]  %s376_s24, 32, %s641_s7, [#allocation10]  }
 0x32c   :  { %538 = dma.done.wait [#allocation4], 256  }
 0x32d   :  { %539 = vsyncadd [#allocation4], 4294967040 }
 0x32e   :  { %540 = dma.done.wait [#allocation10], 32  }
 0x32f   :  { %541 = vsyncadd [#allocation10], 4294967264 }
 0x330   :  { %385 = vsyncpa [#allocation3], 1 }
 0x331   :  { %386 = vsyncpa [#allocation6], 1 }
 0x332   :  { %387 = vsyncpa [#allocation4], 1 }
 0x333   :  { %388 = vsyncpa [#allocation10], 1 }

</bundles_post_ra>
